<compile_context>
chip_gen: v6e
topology: v6e:2x2x1
jax: 0.10.0
libtpu: 0.0.40
codegen_flags: <defaults>
</compile_context>

<pallas_src>
import functools

import jax
import jax.numpy as jnp
from jax.experimental import pallas as pl
from jax.experimental.pallas import tpu as pltpu


_LANE = 128
_SUBLANE = 8
_TARGET_STEP_BYTES = 512 * 1024      # aim to move >= ~0.5 MiB of activations per grid step
_FOLD_ROWS_CAP_16 = 128              # max folded rows for <=16-bit activations (stays HBM-bound)
_FOLD_ROWS_CAP_32 = 64               # max folded rows for f32 activations


def _round_up(x, m):
    return -(-x // m) * m


@functools.lru_cache(maxsize=None)
def _vmem_capacity_bytes():
    try:
        return int(pltpu.get_tpu_info().vmem_capacity_bytes)
    except Exception:
        return 64 * 1024 * 1024       # conservative default (v7x: 64 MiB per TensorCore)


def _vmem_budgets():
    """(data budget for tiles, vmem_limit_bytes) -- generation aware."""
    cap = _vmem_capacity_bytes()
    if cap >= 100 * 1024 * 1024:      # v5e / v6e: 128 MiB VMEM
        return 48 * 1024 * 1024, 96 * 1024 * 1024
    return 24 * 1024 * 1024, 48 * 1024 * 1024    # v7x: 64 MiB per TC


def _tile_vmem_bytes(rows, tile_hw, in_item, w_item):
    io = 2 * rows * tile_hw * (2 * in_item)       # double-buffered input + output tiles
    tmp = 3 * rows * tile_hw * 4                  # f32 temporaries inside the kernel
    wts = 2 * rows * rows * w_item + 2 * rows * 4  # resident weights + f32 biases (no dbl-buf)
    return io + tmp + wts


def _pick_tile_hw(hw, rows_est, in_item, w_item, target, data_budget):
    """Largest lane tile (multiple of 128) fitting the VMEM data budget."""
    hw_pad = _round_up(hw, _LANE)
    tile = min(_round_up(max(target, _LANE), _LANE), hw_pad)
    while tile > _LANE and _tile_vmem_bytes(rows_est, tile, in_item, w_item) > data_budget:
        tile -= _LANE
    return tile


def _choose_batch_fold(batch, c, tile_hw, in_item, w_item, rows_cap, data_budget):
    """Images folded per block (must divide batch). None => per-image (3-D) fallback."""
    per_image = c * tile_hw * in_item
    best = None
    for d in range(1, batch + 1):
        if batch % d:
            continue
        rows = d * c
        if rows > rows_cap:
            break
        if rows % _SUBLANE != 0 and d != batch:
            continue                                  # keep the sublane/full-dim rule
        if _tile_vmem_bytes(rows, tile_hw, in_item, w_item) > data_budget:
            break
        best = d
        if rows >= _SUBLANE and d * per_image >= _TARGET_STEP_BYTES:
            break
    return best


# ---------------------------------------------------------------------------
# Kernel
# ---------------------------------------------------------------------------

def _channel_mix(w, b, v):
    """acc[o, t] = sum_i w[o, i] * v[i, t] + b[o]  (f32 result)."""
    if w.shape[0] < _SUBLANE:
        # Safety path for tiny, unfoldable row counts: unrolled VPU MAC (no MXU).
        wf = w.astype(jnp.float32)
        vf = v.astype(jnp.float32)
        acc = wf[:, 0:1] * vf[0:1, :]
        for i in range(1, w.shape[1]):
            acc = acc + wf[:, i:i + 1] * vf[i:i + 1, :]
        return acc + b
    return jnp.dot(w, v, preferred_element_type=jnp.float32) + b


def _attnmap_kernel(x_ref, w1_ref, b1_ref, w2_ref, b2_ref, o_ref):
    x = x_ref[...]                                # (R, T) in the input dtype
    h = _channel_mix(w1_ref[...], b1_ref[...], x)
    h = h * jax.nn.sigmoid(h)                     # swish in f32 (sigmoid on the EUP)
    h = h.astype(x.dtype)                         # intentional: back to MXU operand dtype
    y = _channel_mix(w2_ref[...], b2_ref[...], h)
    o_ref[...] = y.astype(o_ref.dtype)


# ---------------------------------------------------------------------------
# Wrapper
# ---------------------------------------------------------------------------

@functools.partial(jax.jit, static_argnames=("target_tile_hw",))
def attnmap_forward(x_nchw, w1, b1, w2, b2, *, target_tile_hw=8192):
    """AttnMap forward.  x_nchw: (B,C,H,W); w1/w2: (C,C) (Conv2d weight squeezed); b1/b2: (C,)."""
    B, C, H, W = x_nchw.shape
    HW = H * W
    dtype = x_nchw.dtype
    in_item = dtype.itemsize
    w_item = in_item                               # weights fed in the activation dtype

    if w1.ndim == 4:                               # accept raw Conv2d (C,C,1,1) weights
        w1 = w1[:, :, 0, 0]
    if w2.ndim == 4:
        w2 = w2[:, :, 0, 0]

    data_budget, vmem_limit = _vmem_budgets()

    rows_est = max(C, _SUBLANE)
    tile_hw = _pick_tile_hw(HW, rows_est, in_item, w_item, target_tile_hw, data_budget)
    num_hw_tiles = pl.cdiv(HW, tile_hw)

    rows_cap = _FOLD_ROWS_CAP_16 if in_item <= 2 else _FOLD_ROWS_CAP_32
    rows_cap = max(rows_cap, C)                    # never forbid the unfolded case
    b_blk = _choose_batch_fold(B, C, tile_hw, in_item, w_item, rows_cap, data_budget)

    w1c = w1.astype(dtype)
    w2c = w2.astype(dtype)
    b1f = b1.astype(jnp.float32).reshape(C, 1)
    b2f = b2.astype(jnp.float32).reshape(C, 1)

    if b_blk is not None:
        # Main path: 2-D (B*C, HW) view, b_blk images folded per block via block-diag weights.
        rows = b_blk * C
        num_b_blocks = B // b_blk
        x2 = x_nchw.reshape(B * C, HW)             # free reshape (NCHW is row-major contiguous)
        eye = jnp.eye(b_blk, dtype=dtype)
        w1k = jnp.kron(eye, w1c)                   # (rows, rows) block-diagonal
        w2k = jnp.kron(eye, w2c)
        b1k = jnp.tile(b1f, (b_blk, 1))            # (rows, 1) f32
        b2k = jnp.tile(b2f, (b_blk, 1))

        grid = (num_hw_tiles, num_b_blocks)        # lane-tile axis leads (v7x megacore split)
        x_spec = pl.BlockSpec((rows, tile_hw), lambda t, b: (b, t))
        out_spec = pl.BlockSpec((rows, tile_hw), lambda t, b: (b, t))
        param_specs = [
            pl.BlockSpec((rows, rows), lambda t, b: (0, 0)),   # w1 (grid-invariant)
            pl.BlockSpec((rows, 1), lambda t, b: (0, 0)),      # b1
            pl.BlockSpec((rows, rows), lambda t, b: (0, 0)),   # w2
            pl.BlockSpec((rows, 1), lambda t, b: (0, 0)),      # b2
        ]
        out_shape = jax.ShapeDtypeStruct((B * C, HW), dtype)
        operands = (x2, w1k, b1k, w2k, b2k)
    else:
        # Rare fallback (C not sublane-friendly and no legal batch fold): one image per step.
        rows = C
        x3 = x_nchw.reshape(B, C, HW)
        grid = (num_hw_tiles, B)
        x_spec = pl.BlockSpec((None, C, tile_hw), lambda t, b: (b, 0, t))
        out_spec = pl.BlockSpec((None, C, tile_hw), lambda t, b: (b, 0, t))
        param_specs = [
            pl.BlockSpec((C, C), lambda t, b: (0, 0)),
            pl.BlockSpec((C, 1), lambda t, b: (0, 0)),
            pl.BlockSpec((C, C), lambda t, b: (0, 0)),
            pl.BlockSpec((C, 1), lambda t, b: (0, 0)),
        ]
        out_shape = jax.ShapeDtypeStruct((B, C, HW), dtype)
        operands = (x3, w1c, b1f, w2c, b2f)

    cost = pl.CostEstimate(
        flops=4 * B * HW * C * rows,               # two channel-mix matmuls (incl. fold waste)
        transcendentals=B * HW * C,                # one sigmoid per hidden element
        bytes_accessed=2 * B * C * HW * in_item + 2 * rows * rows * w_item + 2 * rows * 4,
    )
    compiler_params = pltpu.CompilerParams(
        dimension_semantics=("parallel", "parallel"),
        vmem_limit_bytes=vmem_limit,
    )

    out = pl.pallas_call(
        _attnmap_kernel,
        out_shape=out_shape,
        grid_spec=pltpu.PrefetchScalarGridSpec(
            num_scalar_prefetch=0,
            grid=grid,
            in_specs=[x_spec] + param_specs,
            out_specs=out_spec,
        ),
        compiler_params=compiler_params,
        cost_estimate=cost,
    )(*operands)

    return out.reshape(B, C, H, W)


# ---------------------------------------------------------------------------
# Reference + tests
# ---------------------------------------------------------------------------

def _reference(x_nchw, w1, b1, w2, b2):
    hi = jax.lax.Precision.HIGHEST
    x = x_nchw.astype(jnp.float32)
    h = jnp.einsum("oc,bchw->bohw", w1.astype(jnp.float32), x, precision=hi)
    h = h + b1.astype(jnp.float32)[None, :, None, None]
    h = h * jax.nn.sigmoid(h)
    y = jnp.einsum("oc,bchw->bohw", w2.astype(jnp.float32), h, precision=hi)
    y = y + b2.astype(jnp.float32)[None, :, None, None]
    return y


def _make_params(key, dim, dtype, scale):
    k1, k2, k3, k4 = jax.random.split(key, 4)
    w1 = (jax.random.normal(k1, (dim, dim), dtype=jnp.float32) * scale).astype(dtype)
    b1 = (jax.random.normal(k2, (dim,), dtype=jnp.float32) * scale).astype(dtype)
    w2 = (jax.random.normal(k3, (dim, dim), dtype=jnp.float32) * scale).astype(dtype)
    b2 = (jax.random.normal(k4, (dim,), dtype=jnp.float32) * scale).astype(dtype)
    return w1, b1, w2, b2


if __name__ == "__main__":
    key = jax.random.PRNGKey(0)

    # --- Test 1: module's natural tiny shape (dim=4, f32) -> batch folded to 8 dense rows ---
    kx, kp, key = jax.random.split(key, 3)
    B, dim, H, W = 2, 4, 16, 16
    x = jax.random.normal(kx, (B, dim, H, W), dtype=jnp.float32)
    w1, b1, w2, b2 = _make_params(kp, dim, jnp.float32, 0.1)
    out = jax.block_until_ready(attnmap_forward(x, w1, b1, w2, b2))
    ref = _reference(x, w1, b1, w2, b2)
    assert out.shape == (B, dim, H, W)
    assert jnp.allclose(out.astype(jnp.float32), ref, atol=1e-4, rtol=1e-4), \
        "mismatch vs reference (tiny-C folded path)"

    # --- Test 2: larger channel count in bf16 -> native bf16 MXU operands ---
    kx, kp, key = jax.random.split(key, 3)
    B2, dim2, H2, W2 = 2, 64, 16, 16
    x2 = jax.random.normal(kx, (B2, dim2, H2, W2), dtype=jnp.bfloat16)
    w1b, b1b, w2b, b2b = _make_params(kp, dim2, jnp.bfloat16, 0.05)
    out2 = jax.block_until_ready(attnmap_forward(x2, w1b, b1b, w2b, b2b))
    ref2 = _reference(x2, w1b, b1b, w2b, b2b)
    assert out2.shape == (B2, dim2, H2, W2)
    assert jnp.allclose(out2.astype(jnp.float32), ref2, atol=3e-2, rtol=3e-2), \
        "mismatch vs reference (bf16 MXU path)"

    # --- Test 3: H*W not a multiple of 128 -> Pallas masked edge block (no pad / no slice) ---
    kx, kp, key = jax.random.split(key, 3)
    B3, dim3, H3, W3 = 2, 8, 13, 13
    x3 = jax.random.normal(kx, (B3, dim3, H3, W3), dtype=jnp.float32)
    w13, b13, w23, b23 = _make_params(kp, dim3, jnp.float32, 0.1)
    out3 = jax.block_until_ready(attnmap_forward(x3, w13, b13, w23, b23))
    ref3 = _reference(x3, w13, b13, w23, b23)
    assert out3.shape == (B3, dim3, H3, W3)
    assert jnp.allclose(out3.astype(jnp.float32), ref3, atol=1e-4, rtol=1e-4), \
        "mismatch vs reference (partial lane block)"

    # --- Test 4: multiple spatial tiles (small target tile to exercise the grid) ---
    kx, kp, key = jax.random.split(key, 3)
    B4, dim4, H4, W4 = 1, 16, 32, 32
    x4 = jax.random.normal(kx, (B4, dim4, H4, W4), dtype=jnp.float32)
    w14, b14, w24, b24 = _make_params(kp, dim4, jnp.float32, 0.1)
    out4 = jax.block_until_ready(
        attnmap_forward(x4, w14, b14, w24, b24, target_tile_hw=128))
    ref4 = _reference(x4, w14, b14, w24, b24)
    assert out4.shape == (B4, dim4, H4, W4)
    assert jnp.allclose(out4.astype(jnp.float32), ref4, atol=1e-4, rtol=1e-4), \
        "mismatch vs reference (multi-tile grid)"

    print("KERNEL_OK")
</pallas_src>

<mosaic_0001>
module attributes {stable_mosaic.version = 11 : i64} {
  func.func @_attnmap_kernel(%arg0: i32, %arg1: i32, %arg2: memref<8x256xf32, #tpu.memory_space<vmem>>, %arg3: memref<8x8xf32, #tpu.memory_space<vmem>>, %arg4: memref<8x1xf32, #tpu.memory_space<vmem>>, %arg5: memref<8x8xf32, #tpu.memory_space<vmem>>, %arg6: memref<8x1xf32, #tpu.memory_space<vmem>>, %arg7: memref<8x256xf32, #tpu.memory_space<vmem>>) attributes {dimension_semantics = [#tpu.dimension_semantics<parallel>, #tpu.dimension_semantics<parallel>], iteration_bounds = array<i64: 1, 1>, scalar_prefetch = 0 : i64, scratch_operands = 0 : i64, tpu.core_type = #tpu.core_type<tc>, window_params = [{transform_indices = @transform_0, window_bounds = array<i64: 8, 256>}, {pipeline_mode = #tpu.pipeline_mode<synchronous>, transform_indices = @transform_1, window_bounds = array<i64: 8, 8>}, {pipeline_mode = #tpu.pipeline_mode<synchronous>, transform_indices = @transform_2, window_bounds = array<i64: 8, 1>}, {pipeline_mode = #tpu.pipeline_mode<synchronous>, transform_indices = @transform_3, window_bounds = array<i64: 8, 8>}, {pipeline_mode = #tpu.pipeline_mode<synchronous>, transform_indices = @transform_4, window_bounds = array<i64: 8, 1>}, {transform_indices = @transform_5, window_bounds = array<i64: 8, 256>}]} {
    %c0 = arith.constant 0 : index
    %c0_0 = arith.constant 0 : index
    %0 = vector.load %arg2[%c0, %c0_0] : memref<8x256xf32, #tpu.memory_space<vmem>>, vector<8x256xf32>
    %c0_1 = arith.constant 0 : index
    %c0_2 = arith.constant 0 : index
    %1 = vector.load %arg3[%c0_1, %c0_2] : memref<8x8xf32, #tpu.memory_space<vmem>>, vector<8x8xf32>
    %c0_3 = arith.constant 0 : index
    %c0_4 = arith.constant 0 : index
    %2 = vector.load %arg4[%c0_3, %c0_4] : memref<8x1xf32, #tpu.memory_space<vmem>>, vector<8x1xf32>
    %cst = arith.constant dense<0.000000e+00> : vector<8x256xf32>
    %3 = tpu.matmul %1, %0, %cst {dimension_numbers = #tpu.dot_dimension_numbers<[1], [0], [0], [1], [0, 0, 1, 1], [], []>} : vector<8x8xf32>, vector<8x256xf32>, vector<8x256xf32> -> vector<8x256xf32>
    %4 = vector.broadcast %2 : vector<8x1xf32> to vector<8x256xf32>
    %5 = arith.addf %3, %4 : vector<8x256xf32>
    %6 = arith.negf %5 : vector<8x256xf32>
    %7 = math.exp %6 : vector<8x256xf32>
    %cst_5 = arith.constant 1.000000e+00 : f32
    %8 = vector.broadcast %cst_5 : f32 to vector<8x256xf32>
    %9 = arith.addf %8, %7 : vector<8x256xf32>
    %10 = arith.divf %8, %9 : vector<8x256xf32>
    %11 = arith.mulf %5, %10 : vector<8x256xf32>
    %c0_6 = arith.constant 0 : index
    %c0_7 = arith.constant 0 : index
    %12 = vector.load %arg5[%c0_6, %c0_7] : memref<8x8xf32, #tpu.memory_space<vmem>>, vector<8x8xf32>
    %c0_8 = arith.constant 0 : index
    %c0_9 = arith.constant 0 : index
    %13 = vector.load %arg6[%c0_8, %c0_9] : memref<8x1xf32, #tpu.memory_space<vmem>>, vector<8x1xf32>
    %cst_10 = arith.constant dense<0.000000e+00> : vector<8x256xf32>
    %14 = tpu.matmul %12, %11, %cst_10 {dimension_numbers = #tpu.dot_dimension_numbers<[1], [0], [0], [1], [0, 0, 1, 1], [], []>} : vector<8x8xf32>, vector<8x256xf32>, vector<8x256xf32> -> vector<8x256xf32>
    %15 = vector.broadcast %13 : vector<8x1xf32> to vector<8x256xf32>
    %16 = arith.addf %14, %15 : vector<8x256xf32>
    %c0_11 = arith.constant 0 : index
    %c0_12 = arith.constant 0 : index
    %17 = vector.load %arg7[%c0_11, %c0_12] : memref<8x256xf32, #tpu.memory_space<vmem>>, vector<8x256xf32>
    tpu.vector_store %arg7[%c0_11, %c0_12], %16 {strides = array<i32>} : memref<8x256xf32, #tpu.memory_space<vmem>>, vector<8x256xf32>,
    return
  }
  func.func @transform_0(%arg0: i32, %arg1: i32) -> (i32, i32) {
    %c0_i32 = arith.constant 0 : i32
    return %arg1, %arg0 : i32, i32
  }
  func.func @transform_1(%arg0: i32, %arg1: i32) -> (i32, i32) {
    %c0_i32 = arith.constant 0 : i32
    %c0_i32_0 = arith.constant 0 : i32
    %c0_i32_1 = arith.constant 0 : i32
    return %c0_i32, %c0_i32_0 : i32, i32
  }
  func.func @transform_2(%arg0: i32, %arg1: i32) -> (i32, i32) {
    %c0_i32 = arith.constant 0 : i32
    %c0_i32_0 = arith.constant 0 : i32
    %c0_i32_1 = arith.constant 0 : i32
    return %c0_i32, %c0_i32_0 : i32, i32
  }
  func.func @transform_3(%arg0: i32, %arg1: i32) -> (i32, i32) {
    %c0_i32 = arith.constant 0 : i32
    %c0_i32_0 = arith.constant 0 : i32
    %c0_i32_1 = arith.constant 0 : i32
    return %c0_i32, %c0_i32_0 : i32, i32
  }
  func.func @transform_4(%arg0: i32, %arg1: i32) -> (i32, i32) {
    %c0_i32 = arith.constant 0 : i32
    %c0_i32_0 = arith.constant 0 : i32
    %c0_i32_1 = arith.constant 0 : i32
    return %c0_i32, %c0_i32_0 : i32, i32
  }
  func.func @transform_5(%arg0: i32, %arg1: i32) -> (i32, i32) {
    %c0_i32 = arith.constant 0 : i32
    return %arg1, %arg0 : i32, i32
  }
}

</mosaic_0001>

<bundles_post_ra>
// kernel: attnmap_forward.1
= control target key start
LH: loop header
LB: loop body
LE: loop exit
PB: predicated region body
PF: predicated region fallthrough
CT: control target
= control target key end

     0   :  { %v220_v2 = vmov 0.0   ;;  %vm29_vm0 = vcmask 64512   ;;  %v221_v4 = vmov 0   ;;  %s278_s0 = inlined_call_operand.vmem [shape: f32[8,256], index: 0, kind: input, shape index: {}]   ;;  %s279_s1 = inlined_call_operand.vmem [shape: f32[8,8], index: 1, kind: input, shape index: {}]   ;;  %s280_s2 = inlined_call_operand.vmem [shape: f32[8,1], index: 2, kind: input, shape index: {}]   ;;  %s281_s4 = inlined_call_operand.vmem [shape: f32[8,1], index: 4, kind: input, shape index: {}]   ;;  %s282_s3 = inlined_call_operand.vmem [shape: f32[8,8], index: 3, kind: input, shape index: {}]   ;;  %s283_s5 = inlined_call_operand.vmem [shape: f32[8,256], index: 5, kind: output, shape index: {}]  }
   0x1   :  { %v21_v0 = vld [vmem:[%s278_s0 + $0x8] sm:$0xff]  ;;  %v20_v1 = vld [vmem:[%s278_s0] sm:$0xff]  ;;  %97 = vmatprep.mubr.f32.mxu0 %v220_v2  ;;  %211 = vset.pattern.permute.xlu0 %v221_v4 }
   0x2   :  { %v22_v3 = vld [vmem:[%s279_s1] sm:$0xff]  ;;  %63 = vmatprep.subr.mxu0 %v21_v0  ;;  %192 = vmatprep.mubr.f32.mxu1 %v220_v2 }
   0x3   :  { %v23_v5 = vld [vmem:[%s280_s2] sm:$0xff]  ;;  %64 = vmatpush1.msra.mxu0 %v20_v1 }
   0x4   :  { %26 = vperm.xlu0 %211, %v23_v5   ;;  %205 = vmatmul.mubr.msk.f32.vlgmr.msra.gmra.mxu0 %vm29_vm0, %v22_v3  ;;  %v119_v6 = vld [vmem:[%s281_s4] sm:$0xff] }
   0x5   :  { %v118_v22 = vld [vmem:[%s282_s3] sm:$0xff] }
   0x8   :  { %122 = vperm.xlu0 %211, %v119_v6  }
  0x7f   :  { %v27_v7 = vpop.permute.xlu0 %26 }
  0x83   :  { %v123_v23 = vpop.permute.xlu0 %122 }
  0xc4   :  { %v99_v8 = vpop.f32.mrf.mxu0 }
  0xc5   :  { %v100_v9 = vadd.f32 %v99_v8, %v27_v7 }
  0xc6   :  { %v101_v10 = vpop.f32.mrf.mxu0 }
  0xc7   :  { %v206_v11 = vmul.f32 -1.442695, %v100_v9  ;;  %v102_v12 = vadd.f32 %v101_v10, %v27_v7 }
  0xc9   :  { %212 = vpow2.f32 %v206_v11  ;;  %v207_v13 = vmul.f32 -1.442695, %v102_v12 }
  0xcb   :  { %214 = vpow2.f32 %v207_v13 }
  0xd6   :  { %v213_v14 = vpop.eup %212 }
  0xd7   :  { %v110_v15 = vadd.f32 1.0, %v213_v14 }
  0xd8   :  { %v215_v16 = vpop.eup %214 }
  0xd9   :  { %v111_v17 = vadd.f32 1.0, %v215_v16  ;;  %216 = vrcp.f32 %v110_v15 }
  0xdb   :  { %218 = vrcp.f32 %v111_v17 }
  0xe6   :  { %v217_v18 = vpop.eup %216 }
  0xe7   :  { %v116_v21 = vmul.f32 %v217_v18, %v100_v9 }
  0xe8   :  { %v219_v19 = vpop.eup %218 }
  0xe9   :  { %v117_v20 = vmul.f32 %v219_v19, %v102_v12 }
  0xeb   :  { %158 = vmatprep.subr.mxu1 %v117_v20 }
  0xec   :  { %159 = vmatpush1.msra.mxu1 %v116_v21 }
  0xed   :  { %208 = vmatmul.mubr.msk.f32.vlgmr.msra.gmra.mxu1 %vm29_vm0, %v118_v22 }
 0x1ad   :  { %v194_v24 = vpop.f32.mrf.mxu1 }
 0x1ae   :  { %v195_v25 = vadd.f32 %v194_v24, %v123_v23 }
 0x1af   :  { %v196_v26 = vpop.f32.mrf.mxu1 }
 0x1b0   :  { %199 = vst [vmem:[%s283_s5] sm:$0xff] %v195_v25  ;;  %v197_v27 = vadd.f32 %v196_v26, %v123_v23 }
 0x1b2   :  { %200 = vst [vmem:[%s283_s5 + $0x8] sm:$0xff] %v197_v27 }

</bundles_post_ra>
